<compile_context>
chip_gen: v5e
topology: v5e:2x2
jax: 0.10.0
libtpu: 0.0.40
codegen_flags: <defaults>
</compile_context>

<pallas_src>
import jax
import jax.numpy as jnp
from jax.experimental import pallas as pl
from jax.experimental.pallas import tpu as pltpu


def actor_kernel(x_ref, w1_ref, b1_ref, w2_ref, b2_ref,
                 w3_ref, b3_ref, w4_ref, b4_ref, o_ref):
    # One batch tile per grid step; all weights are resident full blocks.
    x = x_ref[...].astype(jnp.bfloat16)

    h1 = jnp.dot(x, w1_ref[...], preferred_element_type=jnp.float32) + b1_ref[...]
    h1 = jnp.maximum(h1, 0.0)

    h2 = jnp.dot(h1.astype(jnp.bfloat16), w2_ref[...],
                 preferred_element_type=jnp.float32) + b2_ref[...]
    h2 = jnp.maximum(h2, 0.0)

    # TODO(synk): nn.Dropout(0.2) is identity in eval mode; training-mode
    # stochastic dropout (pltpu.prng_*) is intentionally not applied here.

    h3 = jnp.dot(h2.astype(jnp.bfloat16), w3_ref[...],
                 preferred_element_type=jnp.float32) + b3_ref[...]
    h3 = jnp.maximum(h3, 0.0)

    h4 = jnp.dot(h3.astype(jnp.bfloat16), w4_ref[...],
                 preferred_element_type=jnp.float32) + b4_ref[...]
    o_ref[...] = jnp.tanh(h4)


def _round_up(n, m):
    return ((n + m - 1) // m) * m


def actor_forward(x, params, *, batch_tile=512):
    """Run the fused Actor MLP. x: (batch, state_dim) f32. Returns (batch, action_dim) f32."""
    (w1, b1, w2, b2, w3, b3, w4, b4) = params
    batch, state_dim = x.shape
    hidden2 = w4.shape[0]          # 128
    action_dim = w4.shape[1]

    # ---- lane-dense output: pad fc4 out-dim up to a multiple of 128 ----
    out_pad = _round_up(max(action_dim, 128), 128)
    w4p = jnp.zeros((hidden2, out_pad), w4.dtype).at[:, :action_dim].set(w4)
    b4p = jnp.zeros((1, out_pad), b4.dtype).at[:, :action_dim].set(b4)

    # ---- batch tiling (rows per grid step); cap keeps v7x VMEM happy ----
    tb = min(batch_tile, _round_up(batch, 8))
    padded_batch = _round_up(batch, tb)
    if padded_batch != batch:
        xp = jnp.zeros((padded_batch, state_dim), x.dtype).at[:batch, :].set(x)
    else:
        xp = x
    grid = (padded_batch // tb,)

    # Weights/biases: full blocks, constant block index -> stay resident.
    def const_spec(shape):
        return pl.BlockSpec(shape, lambda i: (0, 0))

    in_specs = [
        pl.BlockSpec((tb, state_dim), lambda i: (i, 0)),   # x tile
        const_spec(w1.shape), const_spec(b1.shape),
        const_spec(w2.shape), const_spec(b2.shape),
        const_spec(w3.shape), const_spec(b3.shape),
        const_spec(w4p.shape), const_spec(b4p.shape),
    ]
    out_specs = pl.BlockSpec((tb, out_pad), lambda i: (i, 0))

    flops = 2 * padded_batch * (state_dim * 256 + 256 * 256 + 256 * 128
                                + 128 * out_pad)
    weight_bytes = sum(int(a.size) * a.dtype.itemsize
                       for a in (w1, b1, w2, b2, w3, b3, w4p, b4p))
    bytes_accessed = int(xp.size) * 4 + weight_bytes + padded_batch * out_pad * 4

    out_padded = pl.pallas_call(
        actor_kernel,
        out_shape=jax.ShapeDtypeStruct((padded_batch, out_pad), jnp.float32),
        grid=grid,
        in_specs=in_specs,
        out_specs=out_specs,
        compiler_params=pltpu.CompilerParams(
            dimension_semantics=("parallel",),
            vmem_limit_bytes=32 * 1024 * 1024,
        ),
        cost_estimate=pl.CostEstimate(
            flops=flops,
            transcendentals=padded_batch * out_pad,
            bytes_accessed=bytes_accessed,
        ),
    )(xp, w1, b1, w2, b2, w3, b3, w4p, b4p)

    return out_padded[:batch, :action_dim]


# ------------------------- init & reference -------------------------

def xavier_uniform(key, fan_in, fan_out):
    # Matches torch.nn.init.xavier_uniform_ (gain=1.0); returned as (in, out),
    # then cast to bf16 for MXU-native weight storage.
    bound = (6.0 / (fan_in + fan_out)) ** 0.5
    w = jax.random.uniform(key, (fan_in, fan_out), jnp.float32, -bound, bound)
    return w.astype(jnp.bfloat16)


def linear_bias(key, fan_in, fan_out):
    # torch.nn.Linear default bias init: U(-1/sqrt(fan_in), 1/sqrt(fan_in)).
    # Kept in f32 (bias add / ReLU / tanh run in f32 on the VPU/EUP).
    bound = 1.0 / (fan_in ** 0.5)
    return jax.random.uniform(key, (1, fan_out), jnp.float32, -bound, bound)


def init_actor_params(key, state_dim, action_dim):
    ks = jax.random.split(key, 8)
    dims = [(state_dim, 256), (256, 256), (256, 128), (128, action_dim)]
    params = []
    for i, (fi, fo) in enumerate(dims):
        params.append(xavier_uniform(ks[2 * i], fi, fo))
        params.append(linear_bias(ks[2 * i + 1], fi, fo))
    return tuple(params)


def actor_reference(x, params):
    (w1, b1, w2, b2, w3, b3, w4, b4) = params

    def lin(a, w, b):
        return jnp.dot(a.astype(jnp.bfloat16), w,
                       preferred_element_type=jnp.float32) + b

    h = jax.nn.relu(lin(x, w1, b1))
    h = jax.nn.relu(lin(h, w2, b2))
    h = jax.nn.relu(lin(h, w3, b3))
    return jnp.tanh(lin(h, w4, b4))


if __name__ == "__main__":
    state_dim = 8
    action_dim = 4

    key = jax.random.PRNGKey(0)
    k_param, k_x1, k_x2 = jax.random.split(key, 3)
    params = init_actor_params(k_param, state_dim, action_dim)

    # Small RL-rollout-style batch.
    x_small = jax.random.normal(k_x1, (2, state_dim), jnp.float32)
    out_small = jax.block_until_ready(actor_forward(x_small, params))
    ref_small = actor_reference(x_small, params)
    assert out_small.shape == (2, action_dim)
    assert jnp.allclose(out_small, ref_small, atol=1e-4, rtol=1e-4)

    # Larger, non-multiple batch to exercise the batch grid + padding path.
    x_big = jax.random.normal(k_x2, (300, state_dim), jnp.float32)
    out_big = jax.block_until_ready(actor_forward(x_big, params, batch_tile=128))
    ref_big = actor_reference(x_big, params)
    assert out_big.shape == (300, action_dim)
    assert jnp.allclose(out_big, ref_big, atol=1e-4, rtol=1e-4)

    print("KERNEL_OK")
</pallas_src>

<mosaic_0001>
module attributes {stable_mosaic.version = 11 : i64} {
  func.func @actor_kernel(%arg0: i32, %arg1: memref<8x8xf32, #tpu.memory_space<vmem>>, %arg2: memref<8x256xbf16, #tpu.memory_space<vmem>>, %arg3: memref<1x256xf32, #tpu.memory_space<vmem>>, %arg4: memref<256x256xbf16, #tpu.memory_space<vmem>>, %arg5: memref<1x256xf32, #tpu.memory_space<vmem>>, %arg6: memref<256x128xbf16, #tpu.memory_space<vmem>>, %arg7: memref<1x128xf32, #tpu.memory_space<vmem>>, %arg8: memref<128x128xbf16, #tpu.memory_space<vmem>>, %arg9: memref<1x128xf32, #tpu.memory_space<vmem>>, %arg10: memref<8x128xf32, #tpu.memory_space<vmem>>) attributes {dimension_semantics = [#tpu.dimension_semantics<parallel>], iteration_bounds = array<i64: 1>, scalar_prefetch = 0 : i64, scratch_operands = 0 : i64, tpu.core_type = #tpu.core_type<tc>, window_params = [{transform_indices = @transform_0, window_bounds = array<i64: 8, 8>}, {pipeline_mode = #tpu.pipeline_mode<synchronous>, transform_indices = @transform_1, window_bounds = array<i64: 8, 256>}, {pipeline_mode = #tpu.pipeline_mode<synchronous>, transform_indices = @transform_2, window_bounds = array<i64: 1, 256>}, {pipeline_mode = #tpu.pipeline_mode<synchronous>, transform_indices = @transform_3, window_bounds = array<i64: 256, 256>}, {pipeline_mode = #tpu.pipeline_mode<synchronous>, transform_indices = @transform_4, window_bounds = array<i64: 1, 256>}, {pipeline_mode = #tpu.pipeline_mode<synchronous>, transform_indices = @transform_5, window_bounds = array<i64: 256, 128>}, {pipeline_mode = #tpu.pipeline_mode<synchronous>, transform_indices = @transform_6, window_bounds = array<i64: 1, 128>}, {pipeline_mode = #tpu.pipeline_mode<synchronous>, transform_indices = @transform_7, window_bounds = array<i64: 128, 128>}, {pipeline_mode = #tpu.pipeline_mode<synchronous>, transform_indices = @transform_8, window_bounds = array<i64: 1, 128>}, {transform_indices = @transform_9, window_bounds = array<i64: 8, 128>}]} {
    %c0 = arith.constant 0 : index
    %c0_0 = arith.constant 0 : index
    %0 = vector.load %arg1[%c0, %c0_0] : memref<8x8xf32, #tpu.memory_space<vmem>>, vector<8x8xf32>
    %1 = arith.truncf %0 : vector<8x8xf32> to vector<8x8xbf16>
    %c0_1 = arith.constant 0 : index
    %c0_2 = arith.constant 0 : index
    %2 = vector.load %arg2[%c0_1, %c0_2] : memref<8x256xbf16, #tpu.memory_space<vmem>>, vector<8x256xbf16>
    %cst = arith.constant dense<0.000000e+00> : vector<8x256xf32>
    %3 = tpu.matmul %1, %2, %cst {dimension_numbers = #tpu.dot_dimension_numbers<[1], [0], [0], [1], [0, 0, 1, 1], [], []>} : vector<8x8xbf16>, vector<8x256xbf16>, vector<8x256xf32> -> vector<8x256xf32>
    %c0_3 = arith.constant 0 : index
    %c0_4 = arith.constant 0 : index
    %4 = vector.load %arg3[%c0_3, %c0_4] : memref<1x256xf32, #tpu.memory_space<vmem>>, vector<1x256xf32>
    %5 = vector.broadcast %4 : vector<1x256xf32> to vector<8x256xf32>
    %6 = arith.addf %3, %5 : vector<8x256xf32>
    %cst_5 = arith.constant 0.000000e+00 : f32
    %7 = vector.broadcast %cst_5 : f32 to vector<8x256xf32>
    %8 = arith.maximumf %6, %7 : vector<8x256xf32>
    %9 = arith.truncf %8 : vector<8x256xf32> to vector<8x256xbf16>
    %c0_6 = arith.constant 0 : index
    %c0_7 = arith.constant 0 : index
    %10 = vector.load %arg4[%c0_6, %c0_7] : memref<256x256xbf16, #tpu.memory_space<vmem>>, vector<256x256xbf16>
    %cst_8 = arith.constant dense<0.000000e+00> : vector<8x256xf32>
    %11 = tpu.matmul %9, %10, %cst_8 {dimension_numbers = #tpu.dot_dimension_numbers<[1], [0], [0], [1], [0, 0, 1, 1], [], []>} : vector<8x256xbf16>, vector<256x256xbf16>, vector<8x256xf32> -> vector<8x256xf32>
    %c0_9 = arith.constant 0 : index
    %c0_10 = arith.constant 0 : index
    %12 = vector.load %arg5[%c0_9, %c0_10] : memref<1x256xf32, #tpu.memory_space<vmem>>, vector<1x256xf32>
    %13 = vector.broadcast %12 : vector<1x256xf32> to vector<8x256xf32>
    %14 = arith.addf %11, %13 : vector<8x256xf32>
    %cst_11 = arith.constant 0.000000e+00 : f32
    %15 = vector.broadcast %cst_11 : f32 to vector<8x256xf32>
    %16 = arith.maximumf %14, %15 : vector<8x256xf32>
    %17 = arith.truncf %16 : vector<8x256xf32> to vector<8x256xbf16>
    %c0_12 = arith.constant 0 : index
    %c0_13 = arith.constant 0 : index
    %18 = vector.load %arg6[%c0_12, %c0_13] : memref<256x128xbf16, #tpu.memory_space<vmem>>, vector<256x128xbf16>
    %cst_14 = arith.constant dense<0.000000e+00> : vector<8x128xf32>
    %19 = tpu.matmul %17, %18, %cst_14 {dimension_numbers = #tpu.dot_dimension_numbers<[1], [0], [0], [1], [0, 0, 1, 1], [], []>} : vector<8x256xbf16>, vector<256x128xbf16>, vector<8x128xf32> -> vector<8x128xf32>
    %c0_15 = arith.constant 0 : index
    %c0_16 = arith.constant 0 : index
    %20 = vector.load %arg7[%c0_15, %c0_16] : memref<1x128xf32, #tpu.memory_space<vmem>>, vector<1x128xf32>
    %21 = vector.broadcast %20 : vector<1x128xf32> to vector<8x128xf32>
    %22 = arith.addf %19, %21 : vector<8x128xf32>
    %cst_17 = arith.constant 0.000000e+00 : f32
    %23 = vector.broadcast %cst_17 : f32 to vector<8x128xf32>
    %24 = arith.maximumf %22, %23 : vector<8x128xf32>
    %25 = arith.truncf %24 : vector<8x128xf32> to vector<8x128xbf16>
    %c0_18 = arith.constant 0 : index
    %c0_19 = arith.constant 0 : index
    %26 = vector.load %arg8[%c0_18, %c0_19] : memref<128x128xbf16, #tpu.memory_space<vmem>>, vector<128x128xbf16>
    %cst_20 = arith.constant dense<0.000000e+00> : vector<8x128xf32>
    %27 = tpu.matmul %25, %26, %cst_20 {dimension_numbers = #tpu.dot_dimension_numbers<[1], [0], [0], [1], [0, 0, 1, 1], [], []>} : vector<8x128xbf16>, vector<128x128xbf16>, vector<8x128xf32> -> vector<8x128xf32>
    %c0_21 = arith.constant 0 : index
    %c0_22 = arith.constant 0 : index
    %28 = vector.load %arg9[%c0_21, %c0_22] : memref<1x128xf32, #tpu.memory_space<vmem>>, vector<1x128xf32>
    %29 = vector.broadcast %28 : vector<1x128xf32> to vector<8x128xf32>
    %30 = arith.addf %27, %29 : vector<8x128xf32>
    %31 = math.tanh %30 : vector<8x128xf32>
    %c0_23 = arith.constant 0 : index
    %c0_24 = arith.constant 0 : index
    %32 = vector.load %arg10[%c0_23, %c0_24] : memref<8x128xf32, #tpu.memory_space<vmem>>, vector<8x128xf32>
    tpu.vector_store %arg10[%c0_23, %c0_24], %31 {strides = array<i32>} : memref<8x128xf32, #tpu.memory_space<vmem>>, vector<8x128xf32>,
    return
  }
  func.func @transform_0(%arg0: i32) -> (i32, i32) {
    %c0_i32 = arith.constant 0 : i32
    %c0_i32_0 = arith.constant 0 : i32
    return %arg0, %c0_i32 : i32, i32
  }
  func.func @transform_1(%arg0: i32) -> (i32, i32) {
    %c0_i32 = arith.constant 0 : i32
    %c0_i32_0 = arith.constant 0 : i32
    %c0_i32_1 = arith.constant 0 : i32
    return %c0_i32, %c0_i32_0 : i32, i32
  }
  func.func @transform_2(%arg0: i32) -> (i32, i32) {
    %c0_i32 = arith.constant 0 : i32
    %c0_i32_0 = arith.constant 0 : i32
    %c0_i32_1 = arith.constant 0 : i32
    return %c0_i32, %c0_i32_0 : i32, i32
  }
  func.func @transform_3(%arg0: i32) -> (i32, i32) {
    %c0_i32 = arith.constant 0 : i32
    %c0_i32_0 = arith.constant 0 : i32
    %c0_i32_1 = arith.constant 0 : i32
    return %c0_i32, %c0_i32_0 : i32, i32
  }
  func.func @transform_4(%arg0: i32) -> (i32, i32) {
    %c0_i32 = arith.constant 0 : i32
    %c0_i32_0 = arith.constant 0 : i32
    %c0_i32_1 = arith.constant 0 : i32
    return %c0_i32, %c0_i32_0 : i32, i32
  }
  func.func @transform_5(%arg0: i32) -> (i32, i32) {
    %c0_i32 = arith.constant 0 : i32
    %c0_i32_0 = arith.constant 0 : i32
    %c0_i32_1 = arith.constant 0 : i32
    return %c0_i32, %c0_i32_0 : i32, i32
  }
  func.func @transform_6(%arg0: i32) -> (i32, i32) {
    %c0_i32 = arith.constant 0 : i32
    %c0_i32_0 = arith.constant 0 : i32
    %c0_i32_1 = arith.constant 0 : i32
    return %c0_i32, %c0_i32_0 : i32, i32
  }
  func.func @transform_7(%arg0: i32) -> (i32, i32) {
    %c0_i32 = arith.constant 0 : i32
    %c0_i32_0 = arith.constant 0 : i32
    %c0_i32_1 = arith.constant 0 : i32
    return %c0_i32, %c0_i32_0 : i32, i32
  }
  func.func @transform_8(%arg0: i32) -> (i32, i32) {
    %c0_i32 = arith.constant 0 : i32
    %c0_i32_0 = arith.constant 0 : i32
    %c0_i32_1 = arith.constant 0 : i32
    return %c0_i32, %c0_i32_0 : i32, i32
  }
  func.func @transform_9(%arg0: i32) -> (i32, i32) {
    %c0_i32 = arith.constant 0 : i32
    %c0_i32_0 = arith.constant 0 : i32
    return %arg0, %c0_i32 : i32, i32
  }
}

</mosaic_0001>

<bundles_post_ra>
// kernel: tpu_custom_call.1
= control target key start
LH: loop header
LB: loop body
LE: loop exit
PB: predicated region body
PF: predicated region fallthrough
CT: control target
= control target key end

     0   :  { %14 = vsyncpa [#allocation3], 0  ;;  %s1264_s0 = inlined_call_operand.hbm [shape: f32[8,8], index: 0, kind: input, shape index: {}]   ;;  %s1265_s1 = inlined_call_operand.hbm [shape: bf16[8,256], index: 1, kind: input, shape index: {}]   ;;  %s1266_s2 = inlined_call_operand.hbm [shape: f32[1,256], index: 2, kind: input, shape index: {}]   ;;  %s1267_s3 = inlined_call_operand.hbm [shape: bf16[256,256], index: 3, kind: input, shape index: {}]   ;;  %s1268_s4 = inlined_call_operand.vmem [shape: f32[1,256], index: 4, kind: input, shape index: {}]   ;;  %s1269_s5 = inlined_call_operand.hbm [shape: bf16[256,128], index: 5, kind: input, shape index: {}]   ;;  %s1270_s6 = inlined_call_operand.vmem [shape: f32[1,128], index: 6, kind: input, shape index: {}]   ;;  %s1271_s7 = inlined_call_operand.hbm [shape: bf16[128,128], index: 7, kind: input, shape index: {}]   ;;  %s1272_s8 = inlined_call_operand.vmem [shape: f32[1,128], index: 8, kind: input, shape index: {}]   ;;  %s1273_s9 = inlined_call_operand.hbm [shape: f32[8,128], index: 9, kind: output, shape index: {}]  }
   0x1   :  { %15 = vsyncpa [#allocation6], 0 }
   0x2   :  { %16 = vsyncpa [#allocation9], 0 }
   0x3   :  { %17 = vsyncpa [#allocation12], 0  ;;  %s35_s11 = sshll.u32 %s1265_s1, 4  ;;  %s36_s11 = int_to_ptr.hbm [resolvable:$true] %s35_s11 }
   0x4   :  { %18 = vsyncpa [#allocation4], 0  ;;  %s1169_s12 = smov [#allocation5]   ;;  %s56_s16 = sshll.u32 %s1267_s3, 4  ;;  %s57_s16 = int_to_ptr.hbm [resolvable:$true] %s56_s16 }
   0x5   :  { %s37_s13 = sshll.u32 %s1169_s12, 4  ;;  %s1170_s17 = smov [#allocation8]   ;;  %s38_s13 = int_to_ptr.vmem [resolvable:$true] %s37_s13 }
   0x6   :  { %40 = dma.hbm_to_vmem [thread:$0]  %s36_s11, 128, %s38_s13, [#allocation6]  }
   0x7   :  { %s58_s18 = sshll.u32 %s1170_s17, 4  ;;  %s1171_s19 = smov 128   ;;  %s59_s18 = int_to_ptr.vmem [resolvable:$true] %s58_s18 }
   0x8   :  { %s1172_s20 = smov 8   ;;  %s24_s1 = sshll.u32 %s1264_s0, 4  ;;  %s25_s1 = int_to_ptr.hbm [resolvable:$true] %s24_s1 }
   0x9   :  { %64 = dma.hbm_to_vmem [thread:$0]  %s57_s16, 4096, %s59_s18, [#allocation9], %s1171_s19, %s1171_s19, %s1172_s20  }
   0xa   :  { %s1173_s23 = smov [#allocation2]   ;;  %s46_s3 = sshll.u32 %s1266_s2, 4  ;;  %s47_s3 = int_to_ptr.hbm [resolvable:$true] %s46_s3 }
   0xb   :  { %s26_s24 = sshll.u32 %s1173_s23, 4  ;;  %s1174_s27 = smov [#allocation7]   ;;  %s27_s24 = int_to_ptr.vmem [resolvable:$true] %s26_s24 }
   0xc   :  { %29 = dma.hbm_to_vmem [thread:$0]  %s25_s1, 128, %s27_s24, [#allocation3]  }
   0xd   :  { %s48_s28 = sshll.u32 %s1174_s27, 4  ;;  %s71_s10 = sshll.u32 %s1269_s5, 4  ;;  %s49_s28 = int_to_ptr.vmem [resolvable:$true] %s48_s28  ;;  %s72_s10 = int_to_ptr.hbm [resolvable:$true] %s71_s10 }
   0xe   :  { %51 = dma.hbm_to_vmem [thread:$0]  %s47_s3, 32, %s49_s28, [#allocation6]  }
   0xf   :  { %s1175_s0 = smov [#allocation10]   ;;  %s86_s14 = sshll.u32 %s1271_s7, 4  ;;  %s87_s14 = int_to_ptr.hbm [resolvable:$true] %s86_s14 }
  0x10   :  { %s73_s11 = sshll.u32 %s1175_s0, 4  ;;  %s1176_s15 = smov 64   ;;  %s74_s11 = int_to_ptr.vmem [resolvable:$true] %s73_s11 }
  0x11   :  { %s1177_s2 = smov 4   ;;  %s1178_s16 = smov [#allocation11]  }
  0x12   :  { %79 = dma.hbm_to_vmem [thread:$0]  %s72_s10, 2048, %s74_s11, [#allocation9], %s1176_s15, %s1176_s15, %s1177_s2  }
  0x13   :  { %s88_s17 = sshll.u32 %s1178_s16, 4  ;;  %s89_s17 = int_to_ptr.vmem [resolvable:$true] %s88_s17 }
  0x14   :  { %94 = dma.hbm_to_vmem [thread:$0]  %s87_s14, 1024, %s89_s17, [#allocation12], %s1176_s15, %s1176_s15, %s1177_s2  }
  0x15   :  { %1159 = dma.done.wait [#allocation3], 128  }
  0x16   :  { %1160 = vsyncadd [#allocation3], 4294967168 }
  0x17   :  { %1161 = dma.done.wait [#allocation6], 160  }
  0x18   :  { %1162 = vsyncadd [#allocation6], 4294967136 }
  0x19   :  { %1163 = dma.done.wait [#allocation9], 6144  }
  0x1a   :  { %1164 = vsyncadd [#allocation9], 4294961152 }
  0x1b   :  { %1165 = dma.done.wait [#allocation12], 1024  }
  0x1c   :  { %1166 = vsyncadd [#allocation12], 4294966272  ;;  %v124_v0 = vld [vmem:[#allocation5] sm:$0xff]  ;;  %vm140_vm0 = vcmask 1043456   ;;  %v122_v1 = vld [vmem:[#allocation2] sm:$0xff]  ;;  %vm136_vm1 = vcmask 64512  }
  0x1d   :  { %v754_v2 = vld [vmem:[#allocation8 + $0x70] sm:$0xf]  ;;  %v132_v3 = vunpack.c.l.b16 %v124_v0  ;;  %v133_v4 = vunpack.c.h.b16 %v124_v0  ;;  %v935_v5 = vld [vmem:[#allocation8 + $0x74] sm:$0xf0]  ;;  %v934_v6 = vld [vmem:[#allocation8 + $0x74] sm:$0xf]  ;;  %v123_v21 = vpack.c.bf16 %v122_v1, %v122_v1 }
  0x1e   :  { %v756_v7 = vld [vmem:[#allocation8 + $0x78] sm:$0xf0]  ;;  %v755_v8 = vor.u32 %v935_v5, %v754_v2  ;;  %v746_v10 = vld [vmem:[#allocation8 + $0x60] sm:$0xf]  ;;  %v933_v11 = vld [vmem:[#allocation8 + $0x64] sm:$0xf0] }
  0x1f   :  { %v759_v9 = vor.u32 %v934_v6, %v756_v7  ;;  %v932_v12 = vld [vmem:[#allocation8 + $0x64] sm:$0xf]  ;;  %v134_v13 = vpack.c.b16 %v132_v3, %v132_v3  ;;  %v135_v14 = vpack.c.b16 %v133_v4, %v133_v4  ;;  %v748_v15 = vld [vmem:[#allocation8 + $0x68] sm:$0xf0]  ;;  %v747_v16 = vor.u32 %v933_v11, %v746_v10  ;;  %v738_v18 = vld [vmem:[#allocation8 + $0x50] sm:$0xf] }
  0x20   :  { %375 = vmatpush.bf16.msra.mxu2 %v755_v8  ;;  %v751_v17 = vor.u32 %v932_v12, %v748_v15  ;;  %v931_v19 = vld [vmem:[#allocation8 + $0x54] sm:$0xf0]  ;;  %v930_v23 = vld [vmem:[#allocation8 + $0x54] sm:$0xf]  ;;  %v740_v24 = vld [vmem:[#allocation8 + $0x58] sm:$0xf0] }
  0x21   :  { %401 = vmatpush.bf16.msra.mxu0 %v759_v9  ;;  %v142_v20 = vsel %vm140_vm0, %v134_v13, 0  ;;  %v145_v22 = vsel %vm140_vm0, %v135_v14, 0  ;;  %v730_v25 = vld [vmem:[#allocation8 + $0x40] sm:$0xf]  ;;  %v818_v26 = vld [vmem:[#allocation8 + $0xf0] sm:$0xf]  ;;  %v739_v28 = vor.u32 %v931_v19, %v738_v18  ;;  %v743_v29 = vor.u32 %v930_v23, %v740_v24 }
  0x22   :  { %154 = vmatpush.bf16.msra.mxu1 %v142_v20  ;;  %v951_v27 = vld [vmem:[#allocation8 + $0xf4] sm:$0xf0]  ;;  %v929_v30 = vld [vmem:[#allocation8 + $0x44] sm:$0xf0]  ;;  %v950_v32 = vld [vmem:[#allocation8 + $0xf4] sm:$0xf] }
  0x23   :  { %v819_v31 = vor.u32 %v951_v27, %v818_v26  ;;  %v820_v33 = vld [vmem:[#allocation8 + $0xf8] sm:$0xf0]  ;;  %v928_v34 = vld [vmem:[#allocation8 + $0x44] sm:$0xf]  ;;  %v732_v35 = vld [vmem:[#allocation8 + $0x48] sm:$0xf0]  ;;  %v731_v42 = vor.u32 %v929_v30, %v730_v25 }
  0x24   :  { %376 = vmatpush.bf16.msra.mxu2 %v747_v16  ;;  %v823_v36 = vor.u32 %v950_v32, %v820_v33  ;;  %v810_v37 = vld [vmem:[#allocation8 + $0xe0] sm:$0xf]  ;;  %v949_v38 = vld [vmem:[#allocation8 + $0xe4] sm:$0xf0]  ;;  %v948_v40 = vld [vmem:[#allocation8 + $0xe4] sm:$0xf]  ;;  %v735_v43 = vor.u32 %v928_v34, %v732_v35 }
  0x25   :  { %402 = vmatpush.bf16.msra.mxu0 %v751_v17  ;;  %694 = vmatmul.msk.bf16.vlgmr.msra.gmra.mxu1 %vm136_vm1, %v123_v21  ;;  %v811_v39 = vor.u32 %v949_v38, %v810_v37  ;;  %v812_v41 = vld [vmem:[#allocation8 + $0xe8] sm:$0xf0]  ;;  %v722_v44 = vld [vmem:[#allocation8 + $0x30] sm:$0xf]  ;;  %v927_v46 = vld [vmem:[#allocation8 + $0x34] sm:$0xf0] }
  0x26   :  { %167 = vmatpush.bf16.msrb.mxu1 %v145_v22  ;;  %388 = vmatpush.bf16.msra.mxu3 %v819_v31  ;;  %v815_v45 = vor.u32 %v948_v40, %v812_v41  ;;  %v926_v47 = vld [vmem:[#allocation8 + $0x34] sm:$0xf]  ;;  %v724_v48 = vld [vmem:[#allocation8 + $0x38] sm:$0xf0]  ;;  %v723_v49 = vor.u32 %v927_v46, %v722_v44  ;;  %v714_v51 = vld [vmem:[#allocation8 + $0x20] sm:$0xf] }
  0x27   :  { %v727_v50 = vor.u32 %v926_v47, %v724_v48  ;;  %v925_v52 = vld [vmem:[#allocation8 + $0x24] sm:$0xf0]  ;;  %v924_v53 = vld [vmem:[#allocation8 + $0x24] sm:$0xf]  ;;  %v716_v54 = vld [vmem:[#allocation8 + $0x28] sm:$0xf0] }
  0x28   :  { %377 = vmatpush.bf16.msra.mxu2 %v739_v28  ;;  %v715_v55 = vor.u32 %v925_v52, %v714_v51  ;;  %v719_v56 = vor.u32 %v924_v53, %v716_v54  ;;  %v706_v57 = vld [vmem:[#allocation8 + $0x10] sm:$0xf]  ;;  %v923_v58 = vld [vmem:[#allocation8 + $0x14] sm:$0xf0]  ;;  %v922_v62 = vld [vmem:[#allocation8 + $0x14] sm:$0xf] }
  0x29   :  { %403 = vmatpush.bf16.msra.mxu0 %v743_v29  ;;  %v802_v59 = vld [vmem:[#allocation8 + $0xd0] sm:$0xf]  ;;  %v707_v60 = vor.u32 %v923_v58, %v706_v57  ;;  %v947_v61 = vld [vmem:[#allocation8 + $0xd4] sm:$0xf0]  ;;  %v708_v63 = vld [vmem:[#allocation8 + $0x18] sm:$0xf0] }
  0x2a   :  { %414 = vmatpush.bf16.msra.mxu1 %v823_v36  ;;  %389 = vmatpush.bf16.msra.mxu3 %v811_v39  ;;  %v803_v0 = vor.u32 %v947_v61, %v802_v59  ;;  %v711_v1 = vor.u32 %v922_v62, %v708_v63  ;;  %v946_v2 = vld [vmem:[#allocation8 + $0xd4] sm:$0xf]  ;;  %v804_v3 = vld [vmem:[#allocation8 + $0xd8] sm:$0xf0]  ;;  %v698_v5 = vld [vmem:[#allocation8] sm:$0xf] }
  0x2b   :  { %v807_v4 = vor.u32 %v946_v2, %v804_v3  ;;  %v921_v6 = vld [vmem:[#allocation8 + $0x4] sm:$0xf0]  ;;  %v794_v7 = vld [vmem:[#allocation8 + $0xc0] sm:$0xf]  ;;  %v920_v10 = vld [vmem:[#allocation8 + $0x4] sm:$0xf] }
  0x2c   :  { %378 = vmatpush.bf16.msra.mxu2 %v731_v42  ;;  %v699_v8 = vor.u32 %v921_v6, %v698_v5  ;;  %v945_v9 = vld [vmem:[#allocation8 + $0xc4] sm:$0xf0]  ;;  %v700_v11 = vld [vmem:[#allocation8 + $0x8] sm:$0xf0]  ;;  %v944_v14 = vld [vmem:[#allocation8 + $0xc4] sm:$0xf] }
  0x2d   :  { %404 = vmatpush.bf16.msra.mxu0 %v735_v43  ;;  %v795_v12 = vor.u32 %v945_v9, %v794_v7  ;;  %v703_v13 = vor.u32 %v920_v10, %v700_v11  ;;  %v796_v15 = vld [vmem:[#allocation8 + $0xc8] sm:$0xf0]  ;;  %v786_v17 = vld [vmem:[#allocation8 + $0xb0] sm:$0xf]  ;;  %v943_v18 = vld [vmem:[#allocation8 + $0xb4] sm:$0xf0] }
  0x2e   :  { %415 = vmatpush.bf16.msra.mxu1 %v815_v45  ;;  %390 = vmatpush.bf16.msra.mxu3 %v803_v0  ;;  %v799_v16 = vor.u32 %v944_v14, %v796_v15  ;;  %v942_v19 = vld [vmem:[#allocation8 + $0xb4] sm:$0xf]  ;;  %v787_v20 = vor.u32 %v943_v18, %v786_v17  ;;  %v778_v23 = vld [vmem:[#allocation8 + $0xa0] sm:$0xf]  ;;  %v941_v24 = vld [vmem:[#allocation8 + $0xa4] sm:$0xf0] }
  0x2f   :  { %v940_v25 = vld [vmem:[#allocation8 + $0xa4] sm:$0xf]  ;;  %v779_v26 = vor.u32 %v941_v24, %v778_v23  ;;  %v780_v27 = vld [vmem:[#allocation8 + $0xa8] sm:$0xf0]  ;;  %v770_v29 = vld [vmem:[#allocation8 + $0x90] sm:$0xf] }
  0x30   :  { %379 = vmatpush.bf16.msra.mxu2 %v723_v49  ;;  %v783_v28 = vor.u32 %v940_v25, %v780_v27  ;;  %v939_v30 = vld [vmem:[#allocation8 + $0x94] sm:$0xf0]  ;;  %v938_v31 = vld [vmem:[#allocation8 + $0x94] sm:$0xf]  ;;  %v772_v33 = vld [vmem:[#allocation8 + $0x98] sm:$0xf0] }
  0x31   :  { %405 = vmatpush.bf16.msra.mxu0 %v727_v50  ;;  %v771_v32 = vor.u32 %v939_v30, %v770_v29  ;;  %v775_v34 = vor.u32 %v938_v31, %v772_v33  ;;  %v762_v35 = vld [vmem:[#allocation8 + $0x80] sm:$0xf]  ;;  %v937_v36 = vld [vmem:[#allocation8 + $0x84] sm:$0xf0]  ;;  %v936_v37 = vld [vmem:[#allocation8 + $0x84] sm:$0xf] }
  0x32   :  { %416 = vmatpush.bf16.msra.mxu1 %v807_v4  ;;  %391 = vmatpush.bf16.msra.mxu3 %v795_v12  ;;  %v763_v38 = vor.u32 %v937_v36, %v762_v35  ;;  %v764_v39 = vld [vmem:[#allocation8 + $0x88] sm:$0xf0]  ;;  %v967_v41 = vld [vmem:[#allocation10 + $0x78] sm:$0xff]  ;;  %v966_v44 = vld [vmem:[#allocation10 + $0x70] sm:$0xff]  ;;  %s1179_s21 = smov [#allocation13]  }
  0x33   :  { %v767_v40 = vor.u32 %v936_v37, %v764_v39  ;;  %v959_v42 = vld [vmem:[#allocation10 + $0x38] sm:$0xff]  ;;  %v965_v57 = vld [vmem:[#allocation10 + $0x68] sm:$0xff]  ;;  %v958_v58 = vld [vmem:[#allocation10 + $0x30] sm:$0xff]  ;;  %s679_s22 = sshll.u32 %s1179_s21, 4  ;;  %s680_s22 = int_to_ptr.vmem [resolvable:$true] %s679_s22 }
  0x34   :  { %380 = vmatpush.bf16.msra.mxu2 %v715_v55  ;;  %v125_v43 = vld [vmem:[#allocation7] sm:$0x3]  ;;  %v964_v59 = vld [vmem:[#allocation10 + $0x60] sm:$0xff]  ;;  %v962_v63 = vld [vmem:[#allocation10 + $0x50] sm:$0xff] }
  0x35   :  { %406 = vmatpush.bf16.msra.mxu0 %v719_v56  ;;  %695 = vmatmul.msk.bf16.vlgmr.msrb.gmra.mxu1 %vm136_vm1, %v123_v21  ;;  %v788_v21 = vld [vmem:[#allocation8 + $0xb8] sm:$0xf0]  ;;  %v127_v45 = vperm.slane %v125_v43, 0  ;;  %v128_v51 = vperm.slane %v125_v43, 1  ;;  %v956_v62 = vld [vmem:[#allocation10 + $0x20] sm:$0xff]  ;;  %v954_v2 = vld [vmem:[#allocation10 + $0x10] sm:$0xff] }
  0x36   :  { %417 = vmatpush.bf16.msra.mxu1 %v799_v16  ;;  %v791_v22 = vor.u32 %v942_v19, %v788_v21  ;;  %392 = vmatpush.bf16.msra.mxu3 %v787_v20  ;;  %v963_v61 = vld [vmem:[#allocation10 + $0x58] sm:$0xff]  ;;  %v960_v3 = vld [vmem:[#allocation10 + $0x40] sm:$0xff]  ;;  %v953_v4 = vld [vmem:[#allocation10 + $0x8] sm:$0xff] }
  0x37   :  { %v955_v0 = vld [vmem:[#allocation10 + $0x18] sm:$0xff]  ;;  %v952_v5 = vld [vmem:[#allocation10] sm:$0xff]  ;;  %v973_v9 = vld [vmem:[#allocation11 + $0x28] sm:$0xff] }
  0x38   :  { %381 = vmatpush.bf16.msra.mxu2 %v707_v60  ;;  %v957_v60 = vld [vmem:[#allocation10 + $0x28] sm:$0xff]  ;;  %v975_v6 = vld [vmem:[#allocation11 + $0x38] sm:$0xff]  ;;  %v970_v30 = vld [vmem:[#allocation11 + $0x10] sm:$0xff] }
  0x39   :  { %407 = vmatpush.bf16.msra.mxu0 %v711_v1  ;;  %v961_v1 = vld [vmem:[#allocation10 + $0x48] sm:$0xff]  ;;  %v971_v29 = vld [vmem:[#allocation11 + $0x18] sm:$0xff] }
  0x3a   :  { %418 = vmatpush.bf16.msra.mxu1 %v791_v22  ;;  %393 = vmatpush.bf16.msra.mxu3 %v779_v26  ;;  %v209_v11 = vld [vmem:[%s1268_s4] sm:$0x3] }
  0x3b   :  { %v212_v14 = vperm.slane %v209_v11, 1  ;;  %v211_v18 = vperm.slane %v209_v11, 0  ;;  %v969_v31 = vld [vmem:[#allocation11 + $0x8] sm:$0xff] }
  0x3c   :  { %382 = vmatpush.bf16.msra.mxu2 %v699_v8  ;;  %v974_v8 = vld [vmem:[#allocation11 + $0x30] sm:$0xff] }
  0x3d   :  { %408 = vmatpush.bf16.msra.mxu0 %v703_v13  ;;  %v972_v13 = vld [vmem:[#allocation11 + $0x20] sm:$0xff] }
  0x3e   :  { %419 = vmatpush.bf16.msra.mxu1 %v783_v28  ;;  %394 = vmatpush.bf16.msra.mxu3 %v771_v32  ;;  %v968_v32 = vld [vmem:[#allocation11] sm:$0xff] }
  0x40   :  { %563 = vmatpush.bf16.msrb.mxu2 %v959_v42  ;;  %v988_v42 = vld [vmem:[%s1272_s8] ss:$0 sm:$0xff] }
  0x41   :  { %659 = vmatpush.bf16.msrb.mxu0 %v975_v6 }
  0x42   :  { %420 = vmatpush.bf16.msra.mxu1 %v775_v34  ;;  %395 = vmatpush.bf16.msra.mxu3 %v763_v38  ;;  %v987_v34 = vld [vmem:[%s1270_s6] ss:$0 sm:$0xff]  ;;  %s681_s6 = sshll.u32 %s1273_s9, 4  ;;  %s682_s6 = int_to_ptr.hbm [resolvable:$true] %s681_s6 }
  0x44   :  { %564 = vmatpush.bf16.msrb.mxu2 %v958_v58 }
  0x45   :  { %660 = vmatpush.bf16.msrb.mxu0 %v974_v8 }
  0x46   :  { %421 = vmatpush.bf16.msra.mxu1 %v767_v40  ;;  %576 = vmatpush.bf16.msrb.mxu3 %v967_v41 }
  0x48   :  { %565 = vmatpush.bf16.msrb.mxu2 %v957_v60 }
  0x49   :  { %661 = vmatpush.bf16.msrb.mxu0 %v973_v9 }
  0x4a   :  { %577 = vmatpush.bf16.msrb.mxu3 %v966_v44 }
  0x4c   :  { %566 = vmatpush.bf16.msrb.mxu2 %v956_v62 }
  0x4d   :  { %662 = vmatpush.bf16.msrb.mxu0 %v972_v13 }
  0x4e   :  { %578 = vmatpush.bf16.msrb.mxu3 %v965_v57 }
  0x50   :  { %567 = vmatpush.bf16.msrb.mxu2 %v955_v0 }
  0x51   :  { %663 = vmatpush.bf16.msrb.mxu0 %v971_v29 }
  0x52   :  { %579 = vmatpush.bf16.msrb.mxu3 %v964_v59 }
  0x54   :  { %568 = vmatpush.bf16.msrb.mxu2 %v954_v2 }
  0x55   :  { %664 = vmatpush.bf16.msrb.mxu0 %v970_v30 }
  0x56   :  { %580 = vmatpush.bf16.msrb.mxu3 %v963_v61 }
  0x58   :  { %569 = vmatpush.bf16.msrb.mxu2 %v953_v4 }
  0x59   :  { %665 = vmatpush.bf16.msrb.mxu0 %v969_v31 }
  0x5a   :  { %581 = vmatpush.bf16.msrb.mxu3 %v962_v63 }
  0x5c   :  { %570 = vmatpush.bf16.msrb.mxu2 %v952_v5 }
  0x5d   :  { %666 = vmatpush.bf16.msrb.mxu0 %v968_v32 }
  0x5e   :  { %582 = vmatpush.bf16.msrb.mxu3 %v961_v1 }
  0x62   :  { %583 = vmatpush.bf16.msrb.mxu3 %v960_v3 }
  0xa2   :  { %v156_v46 = vpop.f32.mrf.mxu1 }
  0xa3   :  { %v157_v47 = vadd.f32 %v156_v46, %v127_v45 }
  0xa5   :  { %v173_v48 = vmax.f32 %v157_v47, 0.0 }
  0xa7   :  { %v175_v49 = vpack.c.bf16 %v173_v48, %v173_v48 }
  0xa9   :  { %383 = vmatmul.bf16.vlgmr.msra.gmra.mxu2 %v175_v49  ;;  %409 = vmatmul.bf16.vlgmr.msra.gmra.mxu0 %v175_v49 }
  0xaa   :  { %v158_v50 = vpop.f32.mrf.mxu1 }
  0xb2   :  { %v169_v52 = vpop.f32.mrf.mxu1 }
  0xb3   :  { %v170_v53 = vadd.f32 %v169_v52, %v128_v51 }
  0xb5   :  { %v174_v54 = vmax.f32 %v170_v53, 0.0 }
  0xb7   :  { %v176_v55 = vpack.c.bf16 %v174_v54, %v174_v54 }
  0xb9   :  { %396 = vmatmul.bf16.vlgmr.msra.gmra.mxu3 %v176_v55  ;;  %422 = vmatmul.bf16.vlgmr.msra.gmra.mxu1 %v176_v55 }
  0xba   :  { %v171_v56 = vpop.f32.mrf.mxu1 }
 0x126   :  { %v410_v7 = vpop.f32.mrf.mxu0 }
 0x127   :  { %v411_v16 = vadd.f32 %v410_v7, %v212_v14 }
 0x12c   :  { %v384_v10 = vpop.f32.mrf.mxu2 }
 0x12d   :  { %v385_v21 = vadd.f32 %v384_v10, %v211_v18 }
 0x12e   :  { %v412_v12 = vpop.f32.mrf.mxu0 }
 0x134   :  { %v386_v15 = vpop.f32.mrf.mxu2 }
 0x136   :  { %v423_v17 = vpop.f32.mrf.mxu1 }
 0x137   :  { %v424_v19 = vadd.f32 %v423_v17, %v411_v16 }
 0x139   :  { %v428_v20 = vmax.f32 %v424_v19, 0.0 }
 0x13b   :  { %v430_v22 = vpack.c.bf16 %v428_v20, %v428_v20 }
 0x13c   :  { %v397_v23 = vpop.f32.mrf.mxu3 }
 0x13d   :  { %v398_v24 = vadd.f32 %v397_v23, %v385_v21  ;;  %584 = vmatmul.bf16.vlgmr.msrb.gmra.mxu3 %v430_v22 }
 0x13e   :  { %v425_v25 = vpop.f32.mrf.mxu1 }
 0x13f   :  { %v427_v26 = vmax.f32 %v398_v24, 0.0 }
 0x141   :  { %v429_v27 = vpack.c.bf16 %v427_v26, %v427_v26 }
 0x143   :  { %571 = vmatmul.bf16.vlgmr.msrb.gmra.mxu2 %v429_v27 }
 0x144   :  { %v399_v28 = vpop.f32.mrf.mxu3 }
 0x1c0   :  { %v585_v33 = vpop.f32.mrf.mxu3 }
 0x1c6   :  { %v572_v35 = vpop.f32.mrf.mxu2 }
 0x1c7   :  { %v573_v36 = vadd.f32 %v987_v34, %v572_v35 }
 0x1c8   :  { %v587_v37 = vpop.f32.mrf.mxu3 }
 0x1c9   :  { %v586_v38 = vadd.f32 %v585_v33, %v573_v36 }
 0x1cb   :  { %v589_v39 = vmax.f32 %v586_v38, 0.0 }
 0x1cd   :  { %v590_v40 = vpack.c.bf16 %v589_v39, %v589_v39 }
 0x1ce   :  { %v574_v41 = vpop.f32.mrf.mxu2 }
 0x1cf   :  { %667 = vmatmul.bf16.vlgmr.msrb.gmra.mxu0 %v590_v40 }
 0x24c   :  { %v668_v43 = vpop.f32.mrf.mxu0 }
 0x24d   :  { %v669_v44 = vadd.f32 %v988_v42, %v668_v43 }
 0x24f   :  { %989 = vtanh.f32 %v669_v44 }
 0x254   :  { %v670_v45 = vpop.f32.mrf.mxu0 }
 0x255   :  { %v990_v46 = vpop.eup %989 }
 0x256   :  { %673 = vst [vmem:[#allocation13] sm:$0xff] %v990_v46 }
 0x257   :  { %684 = dma.vmem_to_hbm [thread:$0]  %s680_s22, 128, %s682_s6, [#allocation4]  }
 0x258   :  { %1167 = dma.done.wait [#allocation4], 128  }
 0x259   :  { %1168 = vsyncadd [#allocation4], 4294967168 }
 0x25a   :  { %689 = vsyncpa [#allocation3], 1 }
 0x25b   :  { %690 = vsyncpa [#allocation6], 1 }
 0x25c   :  { %691 = vsyncpa [#allocation9], 1 }
 0x25d   :  { %692 = vsyncpa [#allocation12], 1 }
 0x25e   :  { %693 = vsyncpa [#allocation4], 1 }

</bundles_post_ra>
